<compile_context>
chip_gen: v7x
topology: tpu7x:2x2x1
jax: 0.10.0
libtpu: 0.0.40
codegen_flags: <defaults>
</compile_context>

<pallas_src>
import functools

import numpy as np

import jax
import jax.numpy as jnp
from jax.experimental import pallas as pl
from jax.experimental.pallas import tpu as pltpu


# -----------------------------------------------------------------------------
# GroupNorm + ReLU on a time-major (T, C) slab, channels on lanes.
#   segt: (C, G) with entries 1/channels_per_group (zero rows = padded channels)
#   seg:  (G, C) 0/1 membership            (zero cols = padded channels)
# Padded channels therefore neither pollute the group stats nor get normalized
# (their gamma/beta are 0, so they come out exactly 0 and are sliced away).
# -----------------------------------------------------------------------------
def _gn_relu_time_major(y, segt, seg, gamma, beta, inv_t, eps):
    col_sum = jnp.sum(y, axis=0, keepdims=True)            # (1, C)
    col_sq = jnp.sum(y * y, axis=0, keepdims=True)         # (1, C)

    g_mean = jnp.dot(col_sum, segt,
                     preferred_element_type=jnp.float32) * inv_t    # (1, G)
    g_msq = jnp.dot(col_sq, segt,
                    preferred_element_type=jnp.float32) * inv_t     # (1, G)
    # Biased variance (PyTorch GroupNorm); clamp >= 0 against f32 cancellation.
    g_var = jnp.maximum(g_msq - g_mean * g_mean, 0.0)
    g_rstd = jax.lax.rsqrt(g_var + eps)

    # Broadcast group stats back to channels with two tiny (1,G)@(G,C) matmuls.
    ch_rstd = jnp.dot(g_rstd, seg, preferred_element_type=jnp.float32)  # (1, C)
    ch_mean = jnp.dot(g_mean, seg, preferred_element_type=jnp.float32)  # (1, C)

    # Folded affine: 2 VPU ops per element on the (T, C) slab.
    scale = gamma * ch_rstd
    shift = beta - ch_mean * scale
    return jnp.maximum(y * scale + shift, 0.0)


# -----------------------------------------------------------------------------
# Fused Mixup_Branch kernel:
#   (lr_conv + cur_point_conv) + GN + ReLU -> inverse-CDF gather ->
#   proposal_conv + GN + ReLU, all intermediates VMEM-resident.
# -----------------------------------------------------------------------------
def mixup_fused_kernel(xt_ref, flt_ref, idx_ref,
                       w_cl_ref, b_cl_ref, g_cl_ref, be_cl_ref,
                       segt_cl_ref, seg_cl_ref,
                       w_ps_ref, w_pf_ref, w_pc_ref,
                       b_p_ref, g_p_ref, be_p_ref,
                       segt_p_ref, seg_p_ref,
                       out_ref, *, eps):
    """
    xt_ref:   (T, C_in)      time-major input feature (bf16 on v6e/v7x)
    flt_ref:  (Tf, C_fl)     time-major frame-level feature
    idx_ref:  (T, 1) int32   inverse-CDF gather indices
    w_cl_ref: (C_in, 3P)     stacked [lr | cur] 1x1 conv weights (transposed)
    b/g/be_cl_ref: (1, 3P)   stacked biases / GN gamma / GN beta
    segt_cl/seg_cl:          GN segment matrices of the stacked conv
    w_ps/w_pf/w_pc_ref:      proposal_conv weight split column-wise,
                             (C_fl, Cpad), (2P, Cpad), (P, Cpad)
    b/g/be_p_ref: (1, Cpad)  (zero in the padded channels)
    segt_p/seg_p:            GN segment matrices of proposal_conv (padded)
    out_ref:  (T, 2P + Cpad) packed [feat | mixed_padded] output slab
    """
    t = xt_ref.shape[0]
    tf = flt_ref.shape[0]
    two_p = w_pf_ref.shape[0]
    inv_t = 1.0 / t
    mdt = w_cl_ref.dtype                 # bf16 on v6e/v7x, f32 otherwise

    # ---- lr_conv + cur_point_conv as ONE stacked MXU matmul ([lr | cur]) -----
    y_cl = jnp.dot(xt_ref[...], w_cl_ref[...],
                   preferred_element_type=jnp.float32) + b_cl_ref[...]   # (T, 3P)
    z_cl = _gn_relu_time_major(y_cl, segt_cl_ref[...], seg_cl_ref[...],
                               g_cl_ref[...], be_cl_ref[...], inv_t, eps)
    feat = z_cl[:, :two_p]          # lr_conv output (T, 2P); 128-aligned slice
    fm_short = z_cl[:, two_p:]      # cur_point_conv output (T, P)
    out_ref[:, :two_p] = feat       # lane-dense store

    # ---- inverse-CDF sampling as a one-hot matmul gather (stays in VMEM) -----
    # TODO(synk): for Tf >> 256 switch to a scalar-prefetch DMA row gather.
    onehot = (jax.lax.broadcasted_iota(jnp.int32, (t, tf), 1)
              == idx_ref[...]).astype(flt_ref.dtype)                     # (T, Tf)
    sampled = jnp.dot(onehot, flt_ref[...],
                      preferred_element_type=jnp.float32)                # (T, C_fl)

    # ---- proposal_conv: accumulated matmuls, no materialized (4P, T) concat --
    y_p = jnp.dot(sampled.astype(mdt), w_ps_ref[...],
                  preferred_element_type=jnp.float32)
    y_p = y_p + jnp.dot(feat.astype(mdt), w_pf_ref[...],
                        preferred_element_type=jnp.float32)
    y_p = y_p + jnp.dot(fm_short.astype(mdt), w_pc_ref[...],
                        preferred_element_type=jnp.float32)
    y_p = y_p + b_p_ref[...]                                             # (T, Cpad)

    out_ref[:, two_p:] = _gn_relu_time_major(
        y_p, segt_p_ref[...], seg_p_ref[...],
        g_p_ref[...], be_p_ref[...], inv_t, eps)


# -----------------------------------------------------------------------------
# Inverse-CDF index search (tiny (Tf,) scalar work; exact module semantics).
# -----------------------------------------------------------------------------
def inverse_cdf_indices(frame_level_feature, t):
    """frame_level_feature: (C, Tf). Returns (t,) int32 gather indices."""
    mean_values = jnp.mean(frame_level_feature, axis=0)            # (Tf,)
    denom = jnp.maximum(jnp.sum(mean_values), 1e-12)               # 0/0 guard
    mean_values = mean_values / denom
    cdf = jnp.cumsum(mean_values) * t
    cdf = jnp.minimum(cdf.astype(jnp.int32), t - 1)                # .int() + clamp
    # findNearNum: argmin over |cdf[j] - i| with first-index tie-break
    diffs = jnp.abs(cdf[None, :] - jnp.arange(t, dtype=jnp.int32)[:, None])
    return jnp.argmin(diffs, axis=1).astype(jnp.int32)


# -----------------------------------------------------------------------------
# One-time parameter repacking (hoisted out of the jitted forward path)
# -----------------------------------------------------------------------------
def _segment_matrices(gid, num_groups):
    """gid: (C,) group id per channel, -1 marks padded channels."""
    gid = np.asarray(gid)
    member = (gid[:, None] == np.arange(num_groups)[None, :]).astype(np.float32)
    counts = member.sum(axis=0)                    # real channels per group
    segt = member / counts[None, :]                # folds 1/channels_per_group
    return jnp.asarray(segt), jnp.asarray(member.T)


def default_matmul_dtype():
    """bf16 MXU operands on v6e/v7x (full-rate bf16); f32 on v5e / older."""
    try:
        kind = jax.devices()[0].device_kind.lower()
    except Exception:
        return None
    if any(s in kind for s in ("v6", "v7", "7x")):
        return jnp.bfloat16
    return None


def pack_params(params, *, groups=32, matmul_dtype=None):
    """Repack Mixup_Branch parameters into kernel layout ONCE.

    Doing this inside the jitted forward would re-run concats / transposes /
    pads (a full HBM pass over all weights) on every call.
    """
    w_cur, b_cur, g_cur, be_cur = params["cur"]     # (P, C_in), (P,), ...
    w_lr, b_lr, g_lr, be_lr = params["lr"]          # (2P, C_in), ...
    w_pr, b_pr, g_pr, be_pr = params["prop"]        # (C_out, C_fl + 3P), ...

    p = w_cur.shape[0]
    assert w_lr.shape[0] == 2 * p
    c_out = w_pr.shape[0]
    c_fl = w_pr.shape[1] - 3 * p
    assert c_fl > 0
    wdt = jnp.float32 if matmul_dtype is None else matmul_dtype

    # Stacked [lr | cur] so both kernel-side slices start on 128-lane boundaries.
    w_cl = jnp.concatenate([w_lr, w_cur], axis=0).T.astype(wdt)          # (C_in, 3P)
    b_cl = jnp.concatenate([b_lr, b_cur]).reshape(1, 3 * p)
    g_cl = jnp.concatenate([g_lr, g_cur]).reshape(1, 3 * p)
    be_cl = jnp.concatenate([be_lr, be_cur]).reshape(1, 3 * p)

    ch = np.arange(3 * p)
    gid_cl = np.where(ch < 2 * p,
                      ch // ((2 * p) // groups),
                      groups + (ch - 2 * p) // (p // groups))
    segt_cl, seg_cl = _segment_matrices(gid_cl, 2 * groups)

    # proposal_conv weight split to match concat([sampled, feat, fm_short]);
    # output channels zero-padded to a multiple of 128 for lane-dense stores.
    c_out_pad = -(-c_out // 128) * 128
    pad = c_out_pad - c_out

    def prep_w(cols):
        w = cols.T                                   # (K, C_out)
        if pad:
            w = jnp.pad(w, ((0, 0), (0, pad)))
        return w.astype(wdt)

    w_ps = prep_w(w_pr[:, :c_fl])                    # (C_fl, Cpad)
    w_pf = prep_w(w_pr[:, c_fl:c_fl + 2 * p])        # (2P,  Cpad)
    w_pc = prep_w(w_pr[:, c_fl + 2 * p:])            # (P,   Cpad)

    def prep_v(v):
        v = v.reshape(1, c_out)
        return jnp.pad(v, ((0, 0), (0, pad))) if pad else v

    b_p, g_p, be_p = prep_v(b_pr), prep_v(g_pr), prep_v(be_pr)

    gid_p = np.concatenate([np.arange(c_out) // (c_out // groups),
                            np.full(pad, -1, dtype=np.int64)])
    segt_p, seg_p = _segment_matrices(gid_p, groups)

    return dict(w_cl=w_cl, b_cl=b_cl, g_cl=g_cl, be_cl=be_cl,
                segt_cl=segt_cl, seg_cl=seg_cl,
                w_ps=w_ps, w_pf=w_pf, w_pc=w_pc,
                b_p=b_p, g_p=g_p, be_p=be_p,
                segt_p=segt_p, seg_p=seg_p)


# -----------------------------------------------------------------------------
# Mixup_Branch forward (single fused pallas_call)
# -----------------------------------------------------------------------------
def mixup_branch_forward(packed, feature, frame_level_feature, *, eps=1e-5,
                         time_major_out=False):
    """
    packed:              output of pack_params() (arrays only)
    feature:             (1, C_in, t)  NCT
    frame_level_feature: (1, C_fl, Tf) NCT
    returns (mixed_feature (1, C_in, t), feature (1, 2P, t))
    """
    x = feature[0]                       # (C_in, t)
    fl = frame_level_feature[0]          # (C_fl, Tf)
    c_in, t = x.shape
    c_fl, tf = fl.shape

    p = packed["w_pc"].shape[0]
    two_p = packed["w_pf"].shape[0]
    c_out_pad = packed["w_ps"].shape[1]
    c_out = c_in                         # module: proposal_conv out == in_channels
    mdt = packed["w_cl"].dtype
    assert packed["w_cl"].shape[0] == c_in
    assert packed["w_ps"].shape[0] == c_fl

    # Index search outside (tiny); the gather itself runs inside the kernel.
    idx = inverse_cdf_indices(fl, t).reshape(t, 1)

    # Lane-dense, time-major activations (channels on the 128-lane axis);
    # cast once here when bf16 MXU operands are enabled.
    xt = x.T.astype(mdt)                                        # (t, C_in)
    flt = fl.T.astype(mdt)                                      # (Tf, C_fl)

    operands = (xt, flt, idx,
                packed["w_cl"], packed["b_cl"], packed["g_cl"], packed["be_cl"],
                packed["segt_cl"], packed["seg_cl"],
                packed["w_ps"], packed["w_pf"], packed["w_pc"],
                packed["b_p"], packed["g_p"], packed["be_p"],
                packed["segt_p"], packed["seg_p"])

    # Advisory cost estimate so XLA schedules the surrounding small ops freely.
    in_bytes = sum(int(np.prod(a.shape)) * a.dtype.itemsize for a in operands)
    out_bytes = t * (two_p + c_out_pad) * 4
    flops = 2 * t * (c_in * 3 * p + tf * c_fl + (c_fl + 3 * p) * c_out_pad)
    cost = pl.CostEstimate(
        flops=int(flops),
        transcendentals=int(packed["segt_cl"].shape[1] + packed["segt_p"].shape[1]),
        bytes_accessed=int(in_bytes + out_bytes))

    kernel = functools.partial(mixup_fused_kernel, eps=eps)
    vmem = pl.BlockSpec(memory_space=pltpu.MemorySpace.VMEM)

    slab = pl.pallas_call(
        kernel,
        out_shape=jax.ShapeDtypeStruct((t, two_p + c_out_pad), jnp.float32),
        in_specs=[vmem] * len(operands),
        out_specs=vmem,
        cost_estimate=cost,
    )(*operands)

    feat_t = slab[:, :two_p]                    # (t, 2P)
    mixed_t = slab[:, two_p:two_p + c_out]      # (t, C_out)  (padding sliced away)
    if time_major_out:
        return mixed_t[None], feat_t[None]
    # Back to the module's NCT layout (layout plumbing only).
    return mixed_t.T[None], feat_t.T[None]


# -----------------------------------------------------------------------------
# Pure-JAX reference (mirrors the PyTorch module)
# -----------------------------------------------------------------------------
def ref_conv_gn_relu(x, w, b, gamma, beta, *, groups, eps=1e-5):
    y = w @ x + b[:, None]
    c_out, t = y.shape
    yg = y.reshape(groups, -1)
    mean = yg.mean(axis=1, keepdims=True)
    var = yg.var(axis=1, keepdims=True)
    yn = ((yg - mean) / jnp.sqrt(var + eps)).reshape(c_out, t)
    return jnp.maximum(yn * gamma[:, None] + beta[:, None], 0.0)


def ref_forward(params, feature, frame_level_feature, *, groups=32):
    x, fl = feature[0], frame_level_feature[0]
    fm_short = ref_conv_gn_relu(x, *params["cur"], groups=groups)
    feat = ref_conv_gn_relu(x, *params["lr"], groups=groups)
    idx = inverse_cdf_indices(fl, feat.shape[1])
    sampled = jnp.take(fl, idx, axis=1)
    mixed = jnp.concatenate([sampled, feat, fm_short], axis=0)
    mixed = ref_conv_gn_relu(mixed, *params["prop"], groups=groups)
    return mixed[None], feat[None]


# -----------------------------------------------------------------------------
# Parameter init (deterministic, mirrors module __init__ shapes)
# -----------------------------------------------------------------------------
def init_params(key, in_channels, proposal_channels):
    def conv_gn(key, c_in, c_out):
        kw, kb = jax.random.split(key)
        w = 0.05 * jax.random.normal(kw, (c_out, c_in), jnp.float32)
        b = 0.05 * jax.random.normal(kb, (c_out,), jnp.float32)
        gamma = jnp.ones((c_out,), jnp.float32)   # PyTorch GroupNorm default
        beta = jnp.zeros((c_out,), jnp.float32)
        return (w, b, gamma, beta)

    k1, k2, k3 = jax.random.split(key, 3)
    return {
        "cur": conv_gn(k1, in_channels, proposal_channels),
        "lr": conv_gn(k2, in_channels, proposal_channels * 2),
        "prop": conv_gn(k3, proposal_channels * 4, in_channels),
    }


if __name__ == "__main__":
    # Small shapes: in_channels == proposal_channels (required by the concat
    # feeding proposal_conv), both divisible by 32 for GroupNorm(32, .).
    C = 64          # in_channels == proposal_channels
    T = 16          # temporal length t of `feature`
    TF = 32         # temporal length of `frame_level_feature`

    key = jax.random.PRNGKey(0)
    kp, kf, kfl = jax.random.split(key, 3)
    params = init_params(kp, C, C)

    feature = jax.random.normal(kf, (1, C, T), jnp.float32)
    # frame-level features are post-activation (non-negative) in the model
    frame_level_feature = jax.random.uniform(kfl, (1, C, TF), jnp.float32)

    mdt = default_matmul_dtype()                    # bf16 on v6e/v7x, f32 on v5e
    packed = pack_params(params, groups=32, matmul_dtype=mdt)   # one-time repack

    fwd = jax.jit(mixup_branch_forward)
    mixed, feat = fwd(packed, feature, frame_level_feature)
    mixed = jax.block_until_ready(mixed)
    feat = jax.block_until_ready(feat)

    # Sanity-check against the pure-JAX reference (looser tol when bf16 MXU
    # operands are active on v6e/v7x).
    mixed_ref, feat_ref = ref_forward(params, feature, frame_level_feature)
    tol = 2e-2 if mdt is not None else 1e-2
    assert mixed.shape == (1, C, T) and feat.shape == (1, 2 * C, T)
    assert jnp.allclose(mixed, mixed_ref, rtol=tol, atol=tol)
    assert jnp.allclose(feat, feat_ref, rtol=tol, atol=tol)

    print("KERNEL_OK")
</pallas_src>

<mosaic_0001>
module attributes {stable_mosaic.version = 11 : i64} {
  func.func @mixup_fused_kernel(%arg0: memref<16x64xf32, #tpu.memory_space<vmem>>, %arg1: memref<32x64xf32, #tpu.memory_space<vmem>>, %arg2: memref<16x1xi32, #tpu.memory_space<vmem>>, %arg3: memref<64x192xf32, #tpu.memory_space<vmem>>, %arg4: memref<1x192xf32, #tpu.memory_space<vmem>>, %arg5: memref<1x192xf32, #tpu.memory_space<vmem>>, %arg6: memref<1x192xf32, #tpu.memory_space<vmem>>, %arg7: memref<192x64xf32, #tpu.memory_space<vmem>>, %arg8: memref<64x192xf32, #tpu.memory_space<vmem>>, %arg9: memref<64x128xf32, #tpu.memory_space<vmem>>, %arg10: memref<128x128xf32, #tpu.memory_space<vmem>>, %arg11: memref<64x128xf32, #tpu.memory_space<vmem>>, %arg12: memref<1x128xf32, #tpu.memory_space<vmem>>, %arg13: memref<1x128xf32, #tpu.memory_space<vmem>>, %arg14: memref<1x128xf32, #tpu.memory_space<vmem>>, %arg15: memref<128x32xf32, #tpu.memory_space<vmem>>, %arg16: memref<32x128xf32, #tpu.memory_space<vmem>>, %arg17: memref<16x256xf32, #tpu.memory_space<vmem>>) attributes {dimension_semantics = [], scalar_prefetch = 0 : i64, scratch_operands = 0 : i64, tpu.core_type = #tpu.core_type<tc>} {
    %c0 = arith.constant 0 : index
    %c0_0 = arith.constant 0 : index
    %0 = vector.load %arg0[%c0, %c0_0] : memref<16x64xf32, #tpu.memory_space<vmem>>, vector<16x64xf32>
    %c0_1 = arith.constant 0 : index
    %c0_2 = arith.constant 0 : index
    %1 = vector.load %arg3[%c0_1, %c0_2] : memref<64x192xf32, #tpu.memory_space<vmem>>, vector<64x192xf32>
    %cst = arith.constant dense<0.000000e+00> : vector<16x192xf32>
    %2 = tpu.matmul %0, %1, %cst {dimension_numbers = #tpu.dot_dimension_numbers<[1], [0], [0], [1], [0, 0, 1, 1], [], []>} : vector<16x64xf32>, vector<64x192xf32>, vector<16x192xf32> -> vector<16x192xf32>
    %c0_3 = arith.constant 0 : index
    %c0_4 = arith.constant 0 : index
    %3 = vector.load %arg4[%c0_3, %c0_4] : memref<1x192xf32, #tpu.memory_space<vmem>>, vector<1x192xf32>
    %4 = vector.broadcast %3 : vector<1x192xf32> to vector<16x192xf32>
    %5 = arith.addf %2, %4 : vector<16x192xf32>
    %c0_5 = arith.constant 0 : index
    %c0_6 = arith.constant 0 : index
    %6 = vector.load %arg7[%c0_5, %c0_6] : memref<192x64xf32, #tpu.memory_space<vmem>>, vector<192x64xf32>
    %c0_7 = arith.constant 0 : index
    %c0_8 = arith.constant 0 : index
    %7 = vector.load %arg8[%c0_7, %c0_8] : memref<64x192xf32, #tpu.memory_space<vmem>>, vector<64x192xf32>
    %c0_9 = arith.constant 0 : index
    %c0_10 = arith.constant 0 : index
    %8 = vector.load %arg5[%c0_9, %c0_10] : memref<1x192xf32, #tpu.memory_space<vmem>>, vector<1x192xf32>
    %c0_11 = arith.constant 0 : index
    %c0_12 = arith.constant 0 : index
    %9 = vector.load %arg6[%c0_11, %c0_12] : memref<1x192xf32, #tpu.memory_space<vmem>>, vector<1x192xf32>
    %cst_13 = arith.constant dense<0.000000e+00> : vector<192xf32>
    %10 = vector.multi_reduction <add>, %5, %cst_13 [0] : vector<16x192xf32> to vector<192xf32>
    %11 = vector.shape_cast %10 : vector<192xf32> to vector<1x192xf32>
    %12 = arith.mulf %5, %5 : vector<16x192xf32>
    %cst_14 = arith.constant dense<0.000000e+00> : vector<192xf32>
    %13 = vector.multi_reduction <add>, %12, %cst_14 [0] : vector<16x192xf32> to vector<192xf32>
    %14 = vector.shape_cast %13 : vector<192xf32> to vector<1x192xf32>
    %cst_15 = arith.constant dense<0.000000e+00> : vector<1x64xf32>
    %15 = tpu.matmul %11, %6, %cst_15 {dimension_numbers = #tpu.dot_dimension_numbers<[1], [0], [0], [1], [0, 0, 1, 1], [], []>} : vector<1x192xf32>, vector<192x64xf32>, vector<1x64xf32> -> vector<1x64xf32>
    %cst_16 = arith.constant 6.250000e-02 : f32
    %16 = vector.broadcast %cst_16 : f32 to vector<1x64xf32>
    %17 = arith.mulf %15, %16 : vector<1x64xf32>
    %cst_17 = arith.constant dense<0.000000e+00> : vector<1x64xf32>
    %18 = tpu.matmul %14, %6, %cst_17 {dimension_numbers = #tpu.dot_dimension_numbers<[1], [0], [0], [1], [0, 0, 1, 1], [], []>} : vector<1x192xf32>, vector<192x64xf32>, vector<1x64xf32> -> vector<1x64xf32>
    %cst_18 = arith.constant 6.250000e-02 : f32
    %19 = vector.broadcast %cst_18 : f32 to vector<1x64xf32>
    %20 = arith.mulf %18, %19 : vector<1x64xf32>
    %21 = arith.mulf %17, %17 : vector<1x64xf32>
    %22 = arith.subf %20, %21 : vector<1x64xf32>
    %cst_19 = arith.constant 0.000000e+00 : f32
    %23 = vector.broadcast %cst_19 : f32 to vector<1x64xf32>
    %24 = arith.maximumf %22, %23 : vector<1x64xf32>
    %cst_20 = arith.constant 9.99999974E-6 : f32
    %25 = vector.broadcast %cst_20 : f32 to vector<1x64xf32>
    %26 = arith.addf %24, %25 : vector<1x64xf32>
    %27 = math.rsqrt %26 : vector<1x64xf32>
    %cst_21 = arith.constant dense<0.000000e+00> : vector<1x192xf32>
    %28 = tpu.matmul %27, %7, %cst_21 {dimension_numbers = #tpu.dot_dimension_numbers<[1], [0], [0], [1], [0, 0, 1, 1], [], []>} : vector<1x64xf32>, vector<64x192xf32>, vector<1x192xf32> -> vector<1x192xf32>
    %cst_22 = arith.constant dense<0.000000e+00> : vector<1x192xf32>
    %29 = tpu.matmul %17, %7, %cst_22 {dimension_numbers = #tpu.dot_dimension_numbers<[1], [0], [0], [1], [0, 0, 1, 1], [], []>} : vector<1x64xf32>, vector<64x192xf32>, vector<1x192xf32> -> vector<1x192xf32>
    %30 = arith.mulf %8, %28 : vector<1x192xf32>
    %31 = arith.mulf %29, %30 : vector<1x192xf32>
    %32 = arith.subf %9, %31 : vector<1x192xf32>
    %33 = vector.broadcast %30 : vector<1x192xf32> to vector<16x192xf32>
    %34 = arith.mulf %5, %33 : vector<16x192xf32>
    %35 = vector.broadcast %32 : vector<1x192xf32> to vector<16x192xf32>
    %36 = arith.addf %34, %35 : vector<16x192xf32>
    %cst_23 = arith.constant 0.000000e+00 : f32
    %37 = vector.broadcast %cst_23 : f32 to vector<16x192xf32>
    %38 = arith.maximumf %36, %37 : vector<16x192xf32>
    %39 = vector.extract_strided_slice %38 {offsets = [0, 0], sizes = [16, 128], strides = [1, 1]} : vector<16x192xf32> to vector<16x128xf32>
    %40 = vector.extract_strided_slice %38 {offsets = [0, 128], sizes = [16, 64], strides = [1, 1]} : vector<16x192xf32> to vector<16x64xf32>
    %c0_24 = arith.constant 0 : index
    %c0_25 = arith.constant 0 : index
    %41 = vector.load %arg17[%c0_24, %c0_25] : memref<16x256xf32, #tpu.memory_space<vmem>>, vector<16x128xf32>
    tpu.vector_store %arg17[%c0_24, %c0_25], %39 {strides = array<i32>} : memref<16x256xf32, #tpu.memory_space<vmem>>, vector<16x128xf32>,
    %42 = tpu.iota {dimensions = array<i32: 1>} : vector<16x32xi32>
    %c0_26 = arith.constant 0 : index
    %c0_27 = arith.constant 0 : index
    %43 = vector.load %arg2[%c0_26, %c0_27] : memref<16x1xi32, #tpu.memory_space<vmem>>, vector<16x1xi32>
    %44 = vector.broadcast %43 : vector<16x1xi32> to vector<16x32xi32>
    %45 = arith.cmpi eq, %42, %44 : vector<16x32xi32>
    %46 = arith.extui %45 : vector<16x32xi1> to vector<16x32xi32>
    %47 = arith.sitofp %46 : vector<16x32xi32> to vector<16x32xf32>
    %c0_28 = arith.constant 0 : index
    %c0_29 = arith.constant 0 : index
    %48 = vector.load %arg1[%c0_28, %c0_29] : memref<32x64xf32, #tpu.memory_space<vmem>>, vector<32x64xf32>
    %cst_30 = arith.constant dense<0.000000e+00> : vector<16x64xf32>
    %49 = tpu.matmul %47, %48, %cst_30 {dimension_numbers = #tpu.dot_dimension_numbers<[1], [0], [0], [1], [0, 0, 1, 1], [], []>} : vector<16x32xf32>, vector<32x64xf32>, vector<16x64xf32> -> vector<16x64xf32>
    %c0_31 = arith.constant 0 : index
    %c0_32 = arith.constant 0 : index
    %50 = vector.load %arg9[%c0_31, %c0_32] : memref<64x128xf32, #tpu.memory_space<vmem>>, vector<64x128xf32>
    %cst_33 = arith.constant dense<0.000000e+00> : vector<16x128xf32>
    %51 = tpu.matmul %49, %50, %cst_33 {dimension_numbers = #tpu.dot_dimension_numbers<[1], [0], [0], [1], [0, 0, 1, 1], [], []>} : vector<16x64xf32>, vector<64x128xf32>, vector<16x128xf32> -> vector<16x128xf32>
    %c0_34 = arith.constant 0 : index
    %c0_35 = arith.constant 0 : index
    %52 = vector.load %arg10[%c0_34, %c0_35] : memref<128x128xf32, #tpu.memory_space<vmem>>, vector<128x128xf32>
    %cst_36 = arith.constant dense<0.000000e+00> : vector<16x128xf32>
    %53 = tpu.matmul %39, %52, %cst_36 {dimension_numbers = #tpu.dot_dimension_numbers<[1], [0], [0], [1], [0, 0, 1, 1], [], []>} : vector<16x128xf32>, vector<128x128xf32>, vector<16x128xf32> -> vector<16x128xf32>
    %54 = arith.addf %51, %53 : vector<16x128xf32>
    %c0_37 = arith.constant 0 : index
    %c0_38 = arith.constant 0 : index
    %55 = vector.load %arg11[%c0_37, %c0_38] : memref<64x128xf32, #tpu.memory_space<vmem>>, vector<64x128xf32>
    %cst_39 = arith.constant dense<0.000000e+00> : vector<16x128xf32>
    %56 = tpu.matmul %40, %55, %cst_39 {dimension_numbers = #tpu.dot_dimension_numbers<[1], [0], [0], [1], [0, 0, 1, 1], [], []>} : vector<16x64xf32>, vector<64x128xf32>, vector<16x128xf32> -> vector<16x128xf32>
    %57 = arith.addf %54, %56 : vector<16x128xf32>
    %c0_40 = arith.constant 0 : index
    %c0_41 = arith.constant 0 : index
    %58 = vector.load %arg12[%c0_40, %c0_41] : memref<1x128xf32, #tpu.memory_space<vmem>>, vector<1x128xf32>
    %59 = vector.broadcast %58 : vector<1x128xf32> to vector<16x128xf32>
    %60 = arith.addf %57, %59 : vector<16x128xf32>
    %c0_42 = arith.constant 0 : index
    %c0_43 = arith.constant 0 : index
    %61 = vector.load %arg15[%c0_42, %c0_43] : memref<128x32xf32, #tpu.memory_space<vmem>>, vector<128x32xf32>
    %c0_44 = arith.constant 0 : index
    %c0_45 = arith.constant 0 : index
    %62 = vector.load %arg16[%c0_44, %c0_45] : memref<32x128xf32, #tpu.memory_space<vmem>>, vector<32x128xf32>
    %c0_46 = arith.constant 0 : index
    %c0_47 = arith.constant 0 : index
    %63 = vector.load %arg13[%c0_46, %c0_47] : memref<1x128xf32, #tpu.memory_space<vmem>>, vector<1x128xf32>
    %c0_48 = arith.constant 0 : index
    %c0_49 = arith.constant 0 : index
    %64 = vector.load %arg14[%c0_48, %c0_49] : memref<1x128xf32, #tpu.memory_space<vmem>>, vector<1x128xf32>
    %cst_50 = arith.constant dense<0.000000e+00> : vector<128xf32>
    %65 = vector.multi_reduction <add>, %60, %cst_50 [0] : vector<16x128xf32> to vector<128xf32>
    %66 = vector.shape_cast %65 : vector<128xf32> to vector<1x128xf32>
    %67 = arith.mulf %60, %60 : vector<16x128xf32>
    %cst_51 = arith.constant dense<0.000000e+00> : vector<128xf32>
    %68 = vector.multi_reduction <add>, %67, %cst_51 [0] : vector<16x128xf32> to vector<128xf32>
    %69 = vector.shape_cast %68 : vector<128xf32> to vector<1x128xf32>
    %cst_52 = arith.constant dense<0.000000e+00> : vector<1x32xf32>
    %70 = tpu.matmul %66, %61, %cst_52 {dimension_numbers = #tpu.dot_dimension_numbers<[1], [0], [0], [1], [0, 0, 1, 1], [], []>} : vector<1x128xf32>, vector<128x32xf32>, vector<1x32xf32> -> vector<1x32xf32>
    %cst_53 = arith.constant 6.250000e-02 : f32
    %71 = vector.broadcast %cst_53 : f32 to vector<1x32xf32>
    %72 = arith.mulf %70, %71 : vector<1x32xf32>
    %cst_54 = arith.constant dense<0.000000e+00> : vector<1x32xf32>
    %73 = tpu.matmul %69, %61, %cst_54 {dimension_numbers = #tpu.dot_dimension_numbers<[1], [0], [0], [1], [0, 0, 1, 1], [], []>} : vector<1x128xf32>, vector<128x32xf32>, vector<1x32xf32> -> vector<1x32xf32>
    %cst_55 = arith.constant 6.250000e-02 : f32
    %74 = vector.broadcast %cst_55 : f32 to vector<1x32xf32>
    %75 = arith.mulf %73, %74 : vector<1x32xf32>
    %76 = arith.mulf %72, %72 : vector<1x32xf32>
    %77 = arith.subf %75, %76 : vector<1x32xf32>
    %cst_56 = arith.constant 0.000000e+00 : f32
    %78 = vector.broadcast %cst_56 : f32 to vector<1x32xf32>
    %79 = arith.maximumf %77, %78 : vector<1x32xf32>
    %cst_57 = arith.constant 9.99999974E-6 : f32
    %80 = vector.broadcast %cst_57 : f32 to vector<1x32xf32>
    %81 = arith.addf %79, %80 : vector<1x32xf32>
    %82 = math.rsqrt %81 : vector<1x32xf32>
    %cst_58 = arith.constant dense<0.000000e+00> : vector<1x128xf32>
    %83 = tpu.matmul %82, %62, %cst_58 {dimension_numbers = #tpu.dot_dimension_numbers<[1], [0], [0], [1], [0, 0, 1, 1], [], []>} : vector<1x32xf32>, vector<32x128xf32>, vector<1x128xf32> -> vector<1x128xf32>
    %cst_59 = arith.constant dense<0.000000e+00> : vector<1x128xf32>
    %84 = tpu.matmul %72, %62, %cst_59 {dimension_numbers = #tpu.dot_dimension_numbers<[1], [0], [0], [1], [0, 0, 1, 1], [], []>} : vector<1x32xf32>, vector<32x128xf32>, vector<1x128xf32> -> vector<1x128xf32>
    %85 = arith.mulf %63, %83 : vector<1x128xf32>
    %86 = arith.mulf %84, %85 : vector<1x128xf32>
    %87 = arith.subf %64, %86 : vector<1x128xf32>
    %88 = vector.broadcast %85 : vector<1x128xf32> to vector<16x128xf32>
    %89 = arith.mulf %60, %88 : vector<16x128xf32>
    %90 = vector.broadcast %87 : vector<1x128xf32> to vector<16x128xf32>
    %91 = arith.addf %89, %90 : vector<16x128xf32>
    %cst_60 = arith.constant 0.000000e+00 : f32
    %92 = vector.broadcast %cst_60 : f32 to vector<16x128xf32>
    %93 = arith.maximumf %91, %92 : vector<16x128xf32>
    %c0_61 = arith.constant 0 : index
    %c128 = arith.constant 128 : index
    %94 = vector.load %arg17[%c0_61, %c128] : memref<16x256xf32, #tpu.memory_space<vmem>>, vector<16x128xf32>
    tpu.vector_store %arg17[%c0_61, %c128], %93 {strides = array<i32>} : memref<16x256xf32, #tpu.memory_space<vmem>>, vector<16x128xf32>,
    return
  }
}

</mosaic_0001>

<bundles_post_ra>
// kernel: mixup_branch_forward.1
= control target key start
LH: loop header
LB: loop body
LE: loop exit
PB: predicated region body
PF: predicated region fallthrough
CT: control target
= control target key end

     0   :  { %s2771_s0 = inlined_call_operand.hbm [shape: f32[16,64], index: 0, kind: input, shape index: {}]   ;;  %s2772_s1 = inlined_call_operand.vmem [shape: f32[32,64], index: 1, kind: input, shape index: {}]   ;;  %s2773_s2 = inlined_call_operand.vmem [shape: s32[16,1], index: 2, kind: input, shape index: {}]   ;;  %s2774_s3 = inlined_call_operand.vmem [shape: f32[64,192], index: 3, kind: input, shape index: {}]   ;;  %s2775_s4 = inlined_call_operand.vmem [shape: f32[1,192], index: 4, kind: input, shape index: {}]   ;;  %s2776_s5 = inlined_call_operand.hbm [shape: f32[1,192], index: 5, kind: input, shape index: {}]   ;;  %s2777_s6 = inlined_call_operand.hbm [shape: f32[1,192], index: 6, kind: input, shape index: {}]   ;;  %s2778_s7 = inlined_call_operand.vmem [shape: f32[192,64], index: 7, kind: input, shape index: {}]   ;;  %s2779_s8 = inlined_call_operand.vmem [shape: f32[64,192], index: 8, kind: input, shape index: {}]   ;;  %s2780_s9 = inlined_call_operand.vmem [shape: f32[64,128], index: 9, kind: input, shape index: {}]   ;;  %s2781_s10 = inlined_call_operand.vmem [shape: f32[128,128], index: 10, kind: input, shape index: {}]   ;;  %s2782_s11 = inlined_call_operand.vmem [shape: f32[64,128], index: 11, kind: input, shape index: {}]   ;;  %s2783_s12 = inlined_call_operand.vmem [shape: f32[1,128], index: 12, kind: input, shape index: {}]   ;;  %s2784_s13 = inlined_call_operand.hbm [shape: f32[1,128], index: 13, kind: input, shape index: {}]   ;;  %s2785_s14 = inlined_call_operand.hbm [shape: f32[1,128], index: 14, kind: input, shape index: {}]   ;;  %s2786_s15 = inlined_call_operand.vmem [shape: f32[128,32], index: 15, kind: input, shape index: {}]   ;;  %s2787_s16 = inlined_call_operand.vmem [shape: f32[32,128], index: 16, kind: input, shape index: {}]   ;;  %s2788_s17 = inlined_call_operand.vmem [shape: f32[16,256], index: 17, kind: output, shape index: {}]  }
   0x1   :  { %2791 = sst [smem:[#allocation13_spill]] %s2771_s0 }
   0x2   :  { %2792 = sst [smem:[#allocation14_spill]] %s2772_s1 }
   0x3   :  { %22 = vsyncpa [#allocation3], 0 }
   0x4   :  { %23 = vsyncpa [#allocation5], 0 }
   0x5   :  { %24 = vsyncpa [#allocation8], 0  ;;  %s2098_s24 = smov [#allocation4]   ;;  %s2099_s26 = smov [#allocation7]  }
   0x6   :  { %s51_s25 = sshll.u32 %s2098_s24, 4  ;;  %s83_s27 = sshll.u32 %s2099_s26, 4  ;;  %s52_s25 = int_to_ptr.vmem [resolvable:$true] %s51_s25  ;;  %s84_s27 = int_to_ptr.vmem [resolvable:$true] %s83_s27 }
   0x7   :  { %s1982_s0 = scalar_lea.hbm %s2776_s5, 32 }
   0x8   :  { %p1983_p0 = scmp.ne.s32.totalorder %s2776_s5, %s1982_s0  ;;  %p1986_p1 = scmp.lt.u32.totalorder %s1982_s0, %s2776_s5 }
   0xa   :  { %p1988_p2 = pnand %p1986_p1, %p1983_p0 }
   0xc   :  { %1991 = shalt.err (!%p1988_p2)
}
   0xd   :  { %s1992_s20 = scalar_lea.vmem %s52_s25, 32  ;;  %p1997_p4 = scmp.lt.s32.totalorder %s52_s25, %s52_s25 }
   0xe   :  { %p1993_p3 = scmp.ne.s32.totalorder %s52_s25, %s1992_s20  ;;  %p1998_p5 = scmp.lt.s32.totalorder %s1992_s20, %s1992_s20 }
  0x10   :  { %p1999_p6 = por %p1998_p5, %p1997_p4 }
  0x12   :  { %p2000_p7 = pnand %p1999_p6, %p1993_p3 }
  0x14   :  { %2003 = shalt.err (!%p2000_p7)
}
  0x15   :  { %54 = dma.hbm_to_vmem [thread:$0]  %s2776_s5, 32, %s52_s25, [#allocation5]  }
  0x16   :  { %s2004_s26 = scalar_lea.hbm %s2784_s13, 16 }
  0x17   :  { %p2005_p8 = scmp.ne.s32.totalorder %s2784_s13, %s2004_s26  ;;  %p2008_p9 = scmp.lt.u32.totalorder %s2004_s26, %s2784_s13 }
  0x19   :  { %p2010_p10 = pnand %p2008_p9, %p2005_p8 }
  0x1b   :  { %2013 = shalt.err (!%p2010_p10)
}
  0x1c   :  { %s2014_s18 = scalar_lea.vmem %s84_s27, 16  ;;  %s2018_s19 = scalar_lea.vmem %s84_s27, 32 }
  0x1d   :  { %p2015_p11 = scmp.ne.s32.totalorder %s84_s27, %s2014_s18  ;;  %p2019_p12 = scmp.lt.s32.totalorder %s84_s27, %s84_s27 }
  0x1e   :  { %p2020_p13 = scmp.lt.s32.totalorder %s2018_s19, %s2014_s18 }
  0x20   :  { %p2021_p0 = por %p2020_p13, %p2019_p12 }
  0x22   :  { %p2022_p1 = pnand %p2021_p0, %p2015_p11 }
  0x24   :  { %2025 = shalt.err (!%p2022_p1)
}
  0x25   :  { %86 = dma.hbm_to_vmem [thread:$0]  %s2784_s13, 16, %s84_s27, [#allocation8]  }
  0x26   :  { %s2100_s1 = smov [#allocation2]   ;;  %s2793_s23 = sld [smem:[#allocation13_spill]] }
  0x27   :  { %s30_s20 = sshll.u32 %s2100_s1, 4  ;;  %s31_s20 = int_to_ptr.vmem [resolvable:$true] %s30_s20 }
  0x2c   :  { %s2026_s24 = scalar_lea.hbm %s2793_s23, 256 }
  0x2d   :  { %p2027_p2 = scmp.ne.s32.totalorder %s2793_s23, %s2026_s24  ;;  %p2030_p3 = scmp.lt.u32.totalorder %s2026_s24, %s2793_s23 }
  0x2f   :  { %p2032_p4 = pnand %p2030_p3, %p2027_p2 }
  0x31   :  { %2035 = shalt.err (!%p2032_p4)
}
  0x32   :  { %s2036_s30 = scalar_lea.vmem %s31_s20, 256  ;;  %p2041_p6 = scmp.lt.s32.totalorder %s31_s20, %s31_s20 }
  0x33   :  { %p2037_p5 = scmp.ne.s32.totalorder %s31_s20, %s2036_s30  ;;  %p2042_p7 = scmp.lt.s32.totalorder %s2036_s30, %s2036_s30 }
  0x35   :  { %p2043_p8 = por %p2042_p7, %p2041_p6 }
  0x37   :  { %p2044_p9 = pnand %p2043_p8, %p2037_p5 }
  0x39   :  { %2047 = shalt.err (!%p2044_p9)
}
  0x3a   :  { %s2101_s13 = smov 128   ;;  %s2102_s27 = smov 8  }
  0x3b   :  { %36 = dma.hbm_to_vmem [thread:$0]  %s2793_s23, 256, %s31_s20, [#allocation3], %s2101_s13, %s2101_s13, %s2102_s27  }
  0x3c   :  { %s2103_s5 = smov [#allocation6]   ;;  %s2104_s1 = smov [#allocation9]  }
  0x3d   :  { %s61_s25 = sshll.u32 %s2103_s5, 4  ;;  %s93_s21 = sshll.u32 %s2104_s1, 4  ;;  %s62_s25 = int_to_ptr.vmem [resolvable:$true] %s61_s25  ;;  %s94_s21 = int_to_ptr.vmem [resolvable:$true] %s93_s21 }
  0x3e   :  { %s2048_s26 = scalar_lea.hbm %s2777_s6, 32 }
  0x3f   :  { %p2049_p10 = scmp.ne.s32.totalorder %s2777_s6, %s2048_s26  ;;  %p2052_p11 = scmp.lt.u32.totalorder %s2048_s26, %s2777_s6 }
  0x41   :  { %p2054_p12 = pnand %p2052_p11, %p2049_p10 }
  0x43   :  { %2057 = shalt.err (!%p2054_p12)
}
  0x44   :  { %s2058_s20 = scalar_lea.vmem %s62_s25, 32  ;;  %p2063_p0 = scmp.lt.s32.totalorder %s62_s25, %s62_s25 }
  0x45   :  { %p2059_p13 = scmp.ne.s32.totalorder %s62_s25, %s2058_s20  ;;  %p2064_p1 = scmp.lt.s32.totalorder %s2058_s20, %s2058_s20 }
  0x47   :  { %p2065_p2 = por %p2064_p1, %p2063_p0 }
  0x49   :  { %p2066_p3 = pnand %p2065_p2, %p2059_p13 }
  0x4b   :  { %2069 = shalt.err (!%p2066_p3)
}
  0x4c   :  { %64 = dma.hbm_to_vmem [thread:$0]  %s2777_s6, 32, %s62_s25, [#allocation5]  }
  0x4d   :  { %s2070_s19 = scalar_lea.hbm %s2785_s14, 16 }
  0x4e   :  { %p2071_p4 = scmp.ne.s32.totalorder %s2785_s14, %s2070_s19  ;;  %p2074_p5 = scmp.lt.u32.totalorder %s2070_s19, %s2785_s14 }
  0x50   :  { %p2076_p6 = pnand %p2074_p5, %p2071_p4 }
  0x52   :  { %2079 = shalt.err (!%p2076_p6)
}
  0x53   :  { %s2080_s26 = scalar_lea.vmem %s94_s21, 16  ;;  %s2084_s28 = scalar_lea.vmem %s94_s21, 32 }
  0x54   :  { %p2081_p7 = scmp.ne.s32.totalorder %s94_s21, %s2080_s26  ;;  %p2085_p8 = scmp.lt.s32.totalorder %s94_s21, %s94_s21 }
  0x55   :  { %p2086_p9 = scmp.lt.s32.totalorder %s2084_s28, %s2080_s26 }
  0x57   :  { %p2087_p10 = por %p2086_p9, %p2085_p8 }
  0x59   :  { %p2088_p11 = pnand %p2087_p10, %p2081_p7 }
  0x5b   :  { %2091 = shalt.err (!%p2088_p11)
}
  0x5c   :  { %96 = dma.hbm_to_vmem [thread:$0]  %s2785_s14, 16, %s94_s21, [#allocation8]  }
  0x5d   :  { %2092 = dma.done.wait [#allocation3], 256  }
  0x5e   :  { %2093 = vsyncadd [#allocation3], 4294967040 }
  0x5f   :  { %2094 = dma.done.wait [#allocation5], 64  }
  0x60   :  { %2095 = vsyncadd [#allocation5], 4294967232 }
  0x61   :  { %2096 = dma.done.wait [#allocation8], 32  }
  0x62   :  { %2097 = vsyncadd [#allocation8], 4294967264  ;;  %v2105_v0 = vmov 0.0   ;;  %v2106_v1 = vmov 0.0|0.0   ;;  %v119_v2 = vld [vmem:[%s2774_s3 + $0x8] sm:$0xff]  ;;  %v121_v3 = vld [vmem:[%s2774_s3 + $0x18] sm:$0xff] }
  0x63   :  { %217 = vmatprep.mubr.f32.mxu0 %v2105_v0  ;;  %1725 = vmatprep.subr.bf16.mxu1 %v2106_v1  ;;  %v118_v4 = vld [vmem:[%s2774_s3] sm:$0xff]  ;;  %v1709_v5 = vpack.c.bf16 %v121_v3, %v119_v2  ;;  %v120_v6 = vld [vmem:[%s2774_s3 + $0x10] sm:$0xff]  ;;  %v123_v7 = vld [vmem:[%s2774_s3 + $0x28] sm:$0xff]  ;;  %vm146_vm0 = vcmask 523264   ;;  %s2794_s26 = sld [smem:[#allocation14_spill]]  ;;  %vm705_vm2 = vcmask 261120  }
  0x64   :  { %v125_v8 = vld [vmem:[%s2774_s3 + $0x38] sm:$0xff]  ;;  %v1711_v9 = vpack.c.bf16 %v120_v6, %v118_v4  ;;  %v122_v11 = vld [vmem:[%s2774_s3 + $0x20] sm:$0xff]  ;;  %v124_v12 = vld [vmem:[%s2774_s3 + $0x30] sm:$0xff]  ;;  %v2107_v4 = vmov 0   ;;  %vm2109_vm4 = vmmov 0  }
  0x65   :  { %v1713_v10 = vpack.c.bf16 %v125_v8, %v123_v7  ;;  %v127_v13 = vld [vmem:[%s2774_s3 + $0x48] sm:$0xff]  ;;  %1710 = vmatprep.subr.bf16.mxu0 %v1709_v5  ;;  %v129_v14 = vld [vmem:[%s2774_s3 + $0x58] sm:$0xff]  ;;  %v1715_v15 = vpack.c.bf16 %v124_v12, %v122_v11  ;;  %v126_v16 = vld [vmem:[%s2774_s3 + $0x40] sm:$0xff]  ;;  %1977 = vset.pattern.permute.xlu0 %v2107_v4  ;;  %v136_v8 = vlaneseq }
  0x66   :  { %1712 = vmatpush1.bf16.msra.mxu0 %v1711_v9  ;;  %v1717_v17 = vpack.c.bf16 %v129_v14, %v127_v13  ;;  %v128_v18 = vld [vmem:[%s2774_s3 + $0x50] sm:$0xff]  ;;  %v131_v19 = vld [vmem:[%s2774_s3 + $0x68] sm:$0xff]  ;;  %v133_v20 = vld [vmem:[%s2774_s3 + $0x78] sm:$0xff] }
  0x67   :  { %1714 = vmatprep.subr.bf16.mxu0 %v1713_v10  ;;  %v230_v21 = vld [vmem:[%s2778_s7] sm:$0xff]  ;;  %v231_v22 = vld [vmem:[%s2778_s7 + $0x8] sm:$0xff]  ;;  %v232_v23 = vld [vmem:[%s2778_s7 + $0x10] sm:$0xff]  ;;  %v1719_v26 = vpack.c.bf16 %v128_v18, %v126_v16  ;;  %v1721_v27 = vpack.c.bf16 %v133_v20, %v131_v19  ;;  %v2421_v9 = vshrl.u32 %v136_v8, 7 }
  0x68   :  { %v1726_v24 = vpack.c.bf16 %v231_v22, %v230_v21  ;;  %v233_v25 = vld [vmem:[%s2778_s7 + $0x18] sm:$0xff]  ;;  %v130_v28 = vld [vmem:[%s2774_s3 + $0x60] sm:$0xff]  ;;  %v132_v29 = vld [vmem:[%s2774_s3 + $0x70] sm:$0xff] }
  0x69   :  { %v1729_v30 = vpack.c.bf16 %v233_v25, %v232_v23  ;;  %v234_v31 = vld [vmem:[%s2778_s7 + $0x20] sm:$0xff]  ;;  %v235_v32 = vld [vmem:[%s2778_s7 + $0x28] sm:$0xff]  ;;  %v1723_v33 = vpack.c.bf16 %v132_v29, %v130_v28  ;;  %v236_v35 = vld [vmem:[%s2778_s7 + $0x30] sm:$0xff]  ;;  %v2424_v10 = vsub.s32 1, %v2421_v9  ;;  %v2430_v12 = vsub.s32 0, %v2421_v9 }
  0x6a   :  { %1716 = vmatpush1.bf16.msra.mxu0 %v1715_v15  ;;  %1727 = vmatpush1.bf16.msra.mxu1 %v1726_v24  ;;  %v1732_v34 = vpack.c.bf16 %v235_v32, %v234_v31  ;;  %v237_v36 = vld [vmem:[%s2778_s7 + $0x38] sm:$0xff]  ;;  %v116_v37 = vld [vmem:[#allocation2] sm:$0xff]  ;;  %v239_v40 = vld [vmem:[%s2778_s7 + $0x48] sm:$0xff] }
  0x6b   :  { %1718 = vmatprep.subr.bf16.mxu0 %v1717_v17  ;;  %1728 = vmatprep.subr.bf16.mxu1 %v2106_v1  ;;  %v1735_v38 = vpack.c.bf16 %v237_v36, %v236_v35  ;;  %v238_v39 = vld [vmem:[%s2778_s7 + $0x40] sm:$0xff]  ;;  %v117_v41 = vld [vmem:[#allocation2 + $0x8] sm:$0xff]  ;;  %v240_v43 = vld [vmem:[%s2778_s7 + $0x50] sm:$0xff] }
  0x6c   :  { %v1738_v42 = vpack.c.bf16 %v239_v40, %v238_v39  ;;  %v241_v44 = vld [vmem:[%s2778_s7 + $0x58] sm:$0xff]  ;;  %v242_v46 = vld [vmem:[%s2778_s7 + $0x60] sm:$0xff]  ;;  %v243_v47 = vld [vmem:[%s2778_s7 + $0x68] sm:$0xff] }
  0x6d   :  { %v1741_v45 = vpack.c.bf16 %v241_v44, %v240_v43  ;;  %v1744_v48 = vpack.c.bf16 %v243_v47, %v242_v46  ;;  %v244_v49 = vld [vmem:[%s2778_s7 + $0x70] sm:$0xff]  ;;  %v245_v50 = vld [vmem:[%s2778_s7 + $0x78] sm:$0xff]  ;;  %v246_v52 = vld [vmem:[%s2778_s7 + $0x80] sm:$0xff] }
  0x6e   :  { %1720 = vmatpush1.bf16.msra.mxu0 %v1719_v26  ;;  %1730 = vmatpush1.bf16.msra.mxu1 %v1729_v30  ;;  %v1747_v51 = vpack.c.bf16 %v245_v50, %v244_v49  ;;  %v247_v53 = vld [vmem:[%s2778_s7 + $0x88] sm:$0xff]  ;;  %v248_v55 = vld [vmem:[%s2778_s7 + $0x90] sm:$0xff]  ;;  %v249_v56 = vld [vmem:[%s2778_s7 + $0x98] sm:$0xff] }
  0x6f   :  { %1722 = vmatprep.subr.bf16.mxu0 %v1721_v27  ;;  %1731 = vmatprep.subr.bf16.mxu1 %v2106_v1  ;;  %v1750_v54 = vpack.c.bf16 %v247_v53, %v246_v52  ;;  %v1753_v57 = vpack.c.bf16 %v249_v56, %v248_v55  ;;  %v250_v58 = vld [vmem:[%s2778_s7 + $0xa0] sm:$0xff]  ;;  %v251_v59 = vld [vmem:[%s2778_s7 + $0xa8] sm:$0xff]  ;;  %v252_v61 = vld [vmem:[%s2778_s7 + $0xb0] sm:$0xff] }
  0x70   :  { %v1756_v60 = vpack.c.bf16 %v251_v59, %v250_v58  ;;  %v253_v62 = vld [vmem:[%s2778_s7 + $0xb8] sm:$0xff]  ;;  %v687_v2 = vld [vmem:[%s2773_s2] sm:$0xff]  ;;  %v255_v3 = vld [vmem:[%s2779_s8 + $0x8] sm:$0xff] }
  0x71   :  { %v1759_v63 = vpack.c.bf16 %v253_v62, %v252_v61  ;;  %v257_v5 = vld [vmem:[%s2779_s8 + $0x18] sm:$0xff]  ;;  %690 = vperm.xlu0 %1977, %v687_v2   ;;  %v688_v7 = vld [vmem:[%s2773_s2 + $0x8] sm:$0xff]  ;;  %v134_v11 = vld [vmem:[%s2775_s4] sm:$0x3] }
  0x72   :  { %1724 = vmatpush1.bf16.msra.mxu0 %v1723_v33  ;;  %1733 = vmatpush1.bf16.msra.mxu1 %v1732_v34  ;;  %v1797_v6 = vpack.c.bf16 %v257_v5, %v255_v3  ;;  %v143_v13 = vrot.slane %v134_v11, %v2424_v10  ;;  %v139_v14 = vrot.slane %v134_v11, %v2430_v12  ;;  %v256_v55 = vld [vmem:[%s2779_s8 + $0x10] sm:$0xff]  ;;  %v259_v58 = vld [vmem:[%s2779_s8 + $0x28] sm:$0xff]  ;;  %v261_v59 = vld [vmem:[%s2779_s8 + $0x38] sm:$0xff] }
  0x73   :  { %1761 = vmatprep.subr.bf16.mxu0 %v2106_v1  ;;  %1734 = vmatprep.subr.bf16.mxu1 %v2106_v1  ;;  %v1801_v2 = vpack.c.bf16 %v261_v59, %v259_v58  ;;  %v258_v3 = vld [vmem:[%s2779_s8 + $0x20] sm:$0xff]  ;;  %v260_v4 = vld [vmem:[%s2779_s8 + $0x30] sm:$0xff]  ;;  %v263_v5 = vld [vmem:[%s2779_s8 + $0x48] sm:$0xff] }
  0x74   :  { %v803_v59 = vld [vmem:[%s2781_s10 + $0x40] sm:$0xff] }
  0x75   :  { %1428 = vmatmul.mubr.msk.f32.vlgmr.msra.gmra.mrb[0].mxu0 %vm146_vm0, %v116_v37  ;;  %693 = vperm.xlu0 %1977, %v688_v7   ;;  %v1803_v7 = vpack.c.bf16 %v260_v4, %v258_v3  ;;  %v808_v4 = vld [vmem:[%s2781_s10 + $0x68] sm:$0xff] }
  0x76   :  { %223 = vmatprep.mubr.f32.mxu0 %v2105_v0  ;;  %1763 = vmatpush1.bf16.msra.mxu0 %v1726_v24 }
  0x77   :  { %1764 = vmatprep.subr.bf16.mxu0 %v2106_v1  ;;  %1736 = vmatpush1.bf16.msra.mxu1 %v1735_v38 }
  0x78   :  { %1737 = vmatprep.subr.bf16.mxu1 %v2106_v1 }
  0x79   :  { %1429 = vmatmul.mubr.msk.f32.gmra.mrb[2].mxu0 %vm146_vm0, %v117_v41 }
  0x7a   :  { %1766 = vmatpush1.bf16.msra.mxu0 %v1729_v30 }
  0x7b   :  { %1767 = vmatprep.subr.bf16.mxu0 %v2106_v1  ;;  %1739 = vmatpush1.bf16.msra.mxu1 %v1738_v42 }
  0x7c   :  { %1740 = vmatprep.subr.bf16.mxu1 %v2106_v1 }
  0x7e   :  { %1769 = vmatpush1.bf16.msra.mxu0 %v1732_v34 }
  0x7f   :  { %1770 = vmatprep.subr.bf16.mxu0 %v2106_v1  ;;  %1742 = vmatpush1.bf16.msra.mxu1 %v1741_v45 }
  0x80   :  { %1743 = vmatprep.subr.bf16.mxu1 %v2106_v1 }
  0x82   :  { %1772 = vmatpush1.bf16.msra.mxu0 %v1735_v38 }
  0x83   :  { %1773 = vmatprep.subr.bf16.mxu0 %v2106_v1  ;;  %1745 = vmatpush1.bf16.msra.mxu1 %v1744_v48 }
  0x84   :  { %1746 = vmatprep.subr.bf16.mxu1 %v2106_v1 }
  0x86   :  { %1775 = vmatpush1.bf16.msra.mxu0 %v1738_v42 }
  0x87   :  { %1776 = vmatprep.subr.bf16.mxu0 %v2106_v1  ;;  %1748 = vmatpush1.bf16.msra.mxu1 %v1747_v51 }
  0x88   :  { %1749 = vmatprep.subr.bf16.mxu1 %v2106_v1 }
  0x8a   :  { %1778 = vmatpush1.bf16.msra.mxu0 %v1741_v45 }
  0x8b   :  { %1779 = vmatprep.subr.bf16.mxu0 %v2106_v1  ;;  %1751 = vmatpush1.bf16.msra.mxu1 %v1750_v54 }
  0x8c   :  { %1752 = vmatprep.subr.bf16.mxu1 %v2106_v1 }
  0x8e   :  { %1781 = vmatpush1.bf16.msra.mxu0 %v1744_v48 }
  0x8f   :  { %1782 = vmatprep.subr.bf16.mxu0 %v2106_v1  ;;  %1754 = vmatpush1.bf16.msra.mxu1 %v1753_v57 }
  0x90   :  { %1755 = vmatprep.subr.bf16.mxu1 %v2106_v1 }
  0x92   :  { %1784 = vmatpush1.bf16.msra.mxu0 %v1747_v51 }
  0x93   :  { %1785 = vmatprep.subr.bf16.mxu0 %v2106_v1  ;;  %1757 = vmatpush1.bf16.msra.mxu1 %v1756_v60 }
  0x94   :  { %1758 = vmatprep.subr.bf16.mxu1 %v2106_v1 }
  0x96   :  { %1787 = vmatpush1.bf16.msra.mxu0 %v1750_v54  ;;  %v254_v54 = vld [vmem:[%s2779_s8] sm:$0xff] }
  0x97   :  { %1788 = vmatprep.subr.bf16.mxu0 %v2106_v1  ;;  %1760 = vmatpush1.bf16.msra.mxu1 %v1759_v63  ;;  %v1799_v62 = vpack.c.bf16 %v256_v55, %v254_v54  ;;  %v800_v54 = vld [vmem:[%s2781_s10 + $0x28] sm:$0xff] }
  0x98   :  { %1798 = vmatprep.subr.bf16.mxu1 %v1797_v6 }
  0x9a   :  { %1790 = vmatpush1.bf16.msra.mxu0 %v1753_v57 }
  0x9b   :  { %1791 = vmatprep.subr.bf16.mxu0 %v2106_v1 }
  0x9e   :  { %1793 = vmatpush1.bf16.msra.mxu0 %v1756_v60 }
  0x9f   :  { %1794 = vmatprep.subr.bf16.mxu0 %v2106_v1 }
  0xa2   :  { %1796 = vmatpush1.bf16.msra.mxu0 %v1759_v63 }
  0xa3   :  { %1814 = vmatprep.subr.bf16.mxu0 %v1797_v6  ;;  %v265_v6 = vld [vmem:[%s2779_s8 + $0x58] sm:$0xff] }
  0xa4   :  { %v1805_v11 = vpack.c.bf16 %v265_v6, %v263_v5  ;;  %v809_v6 = vld [vmem:[%s2781_s10 + $0x70] sm:$0xff] }
 0x148   :  { %v219_v15 = vpop.f32.mrb[0].mxu0 }
 0x149   :  { %v221_v16 = vpop.f32.mrb[1].mxu0  ;;  %v2436_v18 = vadd.f32 %v219_v15, %v139_v14  ;;  %v267_v15 = vld [vmem:[%s2779_s8 + $0x68] sm:$0xff] }
 0x14a   :  { %v2434_v17 = vadd.f32 %v221_v16, %v143_v13  ;;  %v269_v16 = vld [vmem:[%s2779_s8 + $0x78] sm:$0xff] }
 0x14b   :  { %v288_v24 = vmul.f32 %v2436_v18, %v2436_v18 }
 0x14c   :  { %v225_v19 = vpop.f32.mrb[2].mxu0  ;;  %v289_v22 = vmul.f32 %v2434_v17, %v2434_v17  ;;  %v279_v27 = vsel %vm146_vm0, %v2434_v17, 0.0 }
 0x14d   :  { %v2438_v20 = vadd.f32 %v225_v19, %v139_v14  ;;  %v227_v21 = vpop.f32.mrb[3].mxu0  ;;  %v264_v14 = vld [vmem:[%s2779_s8 + $0x50] sm:$0xff] }
 0x14e   :  { %v2442_v23 = vadd.f32 %v227_v21, %v143_v13  ;;  %v299_v33 = vsel %vm146_vm0, %v289_v22, 0.0  ;;  %v262_v13 = vld [vmem:[%s2779_s8 + $0x40] sm:$0xff]  ;;  %v1809_v21 = vpack.c.bf16 %v269_v16, %v267_v15 }
 0x14f   :  { %v272_v25 = vadd.f32 %v2438_v20, %v2436_v18  ;;  %v290_v26 = vmul.f32 %v2438_v20, %v2438_v20  ;;  %v1807_v19 = vpack.c.bf16 %v264_v14, %v262_v13  ;;  %v266_v22 = vld [vmem:[%s2779_s8 + $0x60] sm:$0xff]  ;;  %v788_v14 = vld [vmem:[%s2780_s9 + $0x8] sm:$0xff] }
 0x150   :  { %v280_v28 = vsel %vm146_vm0, %v2442_v23, 0.0  ;;  %v291_v29 = vmul.f32 %v2442_v23, %v2442_v23  ;;  %v787_v13 = vld [vmem:[%s2780_s9] sm:$0xff] }
 0x151   :  { %v273_v30 = vrot.slane %v272_v25, 4  ;;  %v292_v31 = vadd.f32 %v290_v26, %v288_v24  ;;  %v281_v32 = vadd.f32 %v280_v28, %v279_v27  ;;  %v268_v24 = vld [vmem:[%s2779_s8 + $0x70] sm:$0xff]  ;;  %v701_v26 = vld [vmem:[%s2794_s26] sm:$0xff]  ;;  %v702_v27 = vld [vmem:[%s2794_s26 + $0x8] sm:$0xff]  ;;  %v2578_v15 = vpack.c.bf16 %v788_v14, %v787_v13 }
 0x152   :  { %v300_v34 = vsel %vm146_vm0, %v291_v29, 0.0  ;;  %v1829_v28 = vpack.c.bf16 %v702_v27, %v701_v26  ;;  %v1067_v16 = vld [vmem:[%s2786_s15] sm:$0xff]  ;;  %v1072_v27 = vld [vmem:[%s2786_s15 + $0x28] sm:$0xff] }
 0x153   :  { %v274_v35 = vadd.f32 %v273_v30, %v272_v25  ;;  %v293_v36 = vrot.slane %v292_v31, 4  ;;  %v301_v37 = vadd.f32 %v300_v34, %v299_v33  ;;  %v282_v38 = vrot.slane %v281_v32, 4  ;;  %v1071_v26 = vld [vmem:[%s2786_s15 + $0x20] sm:$0xff]  ;;  %v968_v13 = vld [vmem:[%s2782_s11 + $0x8] sm:$0xff] }
 0x154   :  { %v1811_v25 = vpack.c.bf16 %v268_v24, %v266_v22  ;;  %v1070_v24 = vld [vmem:[%s2786_s15 + $0x18] sm:$0xff] }
 0x155   :  { %v294_v39 = vadd.f32 %v293_v36, %v292_v31  ;;  %v302_v40 = vrot.slane %v301_v37, 4  ;;  %v283_v41 = vadd.f32 %v282_v38, %v281_v32  ;;  %v275_v42 = vrot.slane %v274_v35, 2 }
 0x157   :  { %v295_v43 = vrot.slane %v294_v39, 2  ;;  %v303_v44 = vadd.f32 %v302_v40, %v301_v37  ;;  %v284_v45 = vrot.slane %v283_v41, 2  ;;  %v276_v46 = vadd.f32 %v275_v42, %v274_v35  ;;  %v691_v40 = vpop.permute.xlu0 %690  ;;  %v704_v42 = vld [vmem:[%s2794_s26 + $0x18] sm:$0xff] }
 0x159   :  { %v296_v47 = vadd.f32 %v295_v43, %v294_v39  ;;  %v285_v48 = vadd.f32 %v284_v45, %v283_v41  ;;  %v304_v49 = vrot.slane %v303_v44, 2  ;;  %v277_v50 = vrot.slane %v276_v46, 1  ;;  %v703_v41 = vld [vmem:[%s2794_s26 + $0x10] sm:$0xff] }
 0x15a   :  { %v686_v39 = vand.u32 127, %v136_v8 }
 0x15b   :  { %v286_v51 = vrot.slane %v285_v48, 1  ;;  %v305_v52 = vadd.f32 %v304_v49, %v303_v44  ;;  %v297_v53 = vrot.slane %v296_v47, 1  ;;  %v278_v60 = vadd.f32 %v277_v50, %v276_v46  ;;  %v694_v46 = vpop.permute.xlu0 %693  ;;  %v797_v50 = vld [vmem:[%s2781_s10 + $0x10] sm:$0xff] }
 0x15c   :  { %vm695_vm1 = vcmp.eq.s32.totalorder %v686_v39, %v691_v40  ;;  %v1833_v44 = vpack.c.bf16 %v704_v42, %v703_v41  ;;  %vm696_vm3 = vcmp.eq.s32.totalorder %v686_v39, %v694_v46  ;;  %v270_v42 = vld [vmem:[#allocation4] sm:$0x3] }
 0x15d   :  { %v287_v56 = vadd.f32 %v286_v51, %v285_v48  ;;  %v306_v57 = vrot.slane %v305_v52, 1  ;;  %v298_v63 = vadd.f32 %v297_v53, %v296_v47  ;;  %v1434_v43 = vsel %vm695_vm1, 1.0, %v2105_v0  ;;  %v795_v47 = vld [vmem:[%s2781_s10] sm:$0xff]  ;;  %v796_v48 = vld [vmem:[%s2781_s10 + $0x8] sm:$0xff]  ;;  %v798_v51 = vld [vmem:[%s2781_s10 + $0x18] sm:$0xff] }
 0x15e   :  { %v1435_v8 = vsel %vm696_vm3, 1.0, %v2105_v0  ;;  %v1837_v49 = vpack.c.bf16 %v796_v48, %v795_v47  ;;  %v799_v53 = vld [vmem:[%s2781_s10 + $0x20] sm:$0xff] }
 0x15f   :  { %1430 = vmatprep.mubr.msk.f32.mxu1 %vm146_vm0, %v287_v56  ;;  %v307_v61 = vadd.f32 %v306_v57, %v305_v52  ;;  %v1841_v52 = vpack.c.bf16 %v798_v51, %v797_v50  ;;  %v1845_v55 = vpack.c.bf16 %v800_v54, %v799_v53  ;;  %v801_v56 = vld [vmem:[%s2781_s10 + $0x30] sm:$0xff]  ;;  %v802_v57 = vld [vmem:[%s2781_s10 + $0x38] sm:$0xff] }
 0x160   :  { %376 = vmatmul.mubr.f32.vlgmr.msra.gmra.mrb[0].mxu1 %v278_v60  ;;  %v1849_v58 = vpack.c.bf16 %v802_v57, %v801_v56  ;;  %v804_v60 = vld [vmem:[%s2781_s10 + $0x48] sm:$0xff] }
 0x161   :  { %1431 = vmatprep.mubr.msk.f32.mxu0 %vm146_vm0, %v307_v61  ;;  %1800 = vmatpush1.bf16.msra.mxu1 %v1799_v62  ;;  %v1853_v61 = vpack.c.bf16 %v804_v60, %v803_v59 }
 0x162   :  { %450 = vmatmul.mubr.f32.vlgmr.msra.gmra.mrb[4].mxu0 %v298_v63  ;;  %1802 = vmatprep.subr.bf16.mxu1 %v1801_v2  ;;  %v806_v63 = vld [vmem:[%s2781_s10 + $0x58] sm:$0xff] }
 0x163   :  { %1816 = vmatpush1.bf16.msra.mxu0 %v1799_v62  ;;  %602 = vmatprep.mubr.f32.mxu0 %v2105_v0  ;;  %v805_v62 = vld [vmem:[%s2781_s10 + $0x50] sm:$0xff] }
 0x164   :  { %1818 = vmatprep.subr.bf16.mxu0 %v1801_v2  ;;  %528 = vmatprep.mubr.f32.mxu1 %v2105_v0  ;;  %v807_v2 = vld [vmem:[%s2781_s10 + $0x60] sm:$0xff]  ;;  %v1857_v3 = vpack.c.bf16 %v806_v63, %v805_v62  ;;  %v789_v62 = vld [vmem:[%s2780_s9 + $0x10] sm:$0xff] }
 0x165   :  { %1804 = vmatpush1.bf16.msra.mxu1 %v1803_v7  ;;  %v1861_v5 = vpack.c.bf16 %v808_v4, %v807_v2 }
 0x166   :  { %1806 = vmatprep.subr.bf16.mxu1 %v1805_v11 }
 0x167   :  { %1820 = vmatpush1.bf16.msra.mxu0 %v1803_v7  ;;  %v810_v7 = vld [vmem:[%s2781_s10 + $0x78] sm:$0xff] }
 0x168   :  { %1822 = vmatprep.subr.bf16.mxu0 %v1805_v11  ;;  %v1865_v11 = vpack.c.bf16 %v810_v7, %v809_v6  ;;  %v794_v6 = vld [vmem:[%s2780_s9 + $0x38] sm:$0xff] }
 0x169   :  { %1808 = vmatpush1.bf16.msra.mxu1 %v1807_v19 }
 0x16a   :  { %1810 = vmatprep.subr.bf16.mxu1 %v1809_v21 }
 0x16b   :  { %1824 = vmatpush1.bf16.msra.mxu0 %v1807_v19  ;;  %v1068_v19 = vld [vmem:[%s2786_s15 + $0x8] sm:$0xff] }
 0x16c   :  { %1826 = vmatprep.subr.bf16.mxu0 %v1809_v21  ;;  %v1069_v21 = vld [vmem:[%s2786_s15 + $0x10] sm:$0xff]  ;;  %v2590_v22 = vpack.c.bf16 %v1068_v19, %v1067_v16  ;;  %v970_v16 = vld [vmem:[%s2782_s11 + $0x18] sm:$0xff] }
 0x16d   :  { %1812 = vmatpush1.bf16.msra.mxu1 %v1811_v25 }
 0x16e   :  { %1830 = vmatprep.subr.bf16.mxu1 %v1829_v28 }
 0x16f   :  { %1828 = vmatpush1.bf16.msra.mxu0 %v1811_v25  ;;  %v2596_v25 = vpack.c.bf16 %v1070_v24, %v1069_v21  ;;  %v971_v24 = vld [vmem:[%s2782_s11 + $0x20] sm:$0xff] }
 0x170   :  { %1901 = vmatprep.subr.bf16.mxu0 %v2106_v1 }
 0x233   :  { %v377_v29 = vpop.f32.mrb[0].mxu1 }
 0x234   :  { %v381_v30 = vmul.f32 0.0625, %v377_v29  ;;  %v379_v31 = vpop.f32.mrb[1].mxu1  ;;  %v1073_v29 = vld [vmem:[%s2786_s15 + $0x30] sm:$0xff] }
 0x235   :  { %v451_v32 = vpop.f32.mrb[4].mxu0 }
 0x236   :  { %v456_v33 = vmul.f32 %v381_v30, %v381_v30  ;;  %v455_v34 = vmul.f32 0.0625, %v451_v32  ;;  %v453_v35 = vpop.f32.mrb[5].mxu0  ;;  %1433 = vmatmul.mubr.msk.f32.vlgmr.msra.gmra.mrb[6].mxu0 %vm146_vm0, %v381_v30  ;;  %v1074_v30 = vld [vmem:[%s2786_s15 + $0x38] sm:$0xff] }
 0x237   :  { %1903 = vmatpush3.bf16.msra.mxu0 %v2590_v22  ;;  %v2616_v31 = vpack.c.bf16 %v1074_v30, %v1073_v29  ;;  %v973_v29 = vld [vmem:[%s2782_s11 + $0x30] sm:$0xff]  ;;  %v974_v30 = vld [vmem:[%s2782_s11 + $0x38] sm:$0xff]  ;;  %1649 = vmatprep.mubr.msk.f32.mxu0 %vm2109_vm4, %v2105_v0 }
 0x238   :  { %v457_v36 = vsub.f32 %v455_v34, %v456_v33  ;;  %1904 = vmatprep.subr.bf16.mxu0 %v2106_v1  ;;  %v2108_v34 = vmov 1966171168  }
 0x239   :  { %v613_v35 = vunpack.c.l.s4 %v2108_v34  ;;  %v1075_v34 = vld [vmem:[%s2786_s15 + $0x40] sm:$0xff] }
 0x23a   :  { %v458_v37 = vmax.f32 %v457_v36, 0.0 }
 0x23b   :  { %1906 = vmatpush3.bf16.msra.mxu0 %v2596_v25  ;;  %v614_v36 = vunpack.c.0.s8 %v613_v35  ;;  %v1076_v35 = vld [vmem:[%s2786_s15 + $0x48] sm:$0xff] }
 0x23c   :  { %v459_v38 = vadd.f32 1e-05, %v458_v37  ;;  %1907 = vmatprep.subr.bf16.mxu0 %v2106_v1 }
 0x23e   :  { %1978 = vrsqrt.f32 %v459_v38  ;;  %v617_v38 = vsub.s32 %v614_v36, %v2421_v9  ;;  %v1914_v36 = vpack.c.bf16 %v1076_v35, %v1075_v34 }
 0x248   :  { %v1979_v45 = vpop.eup %1978 }
 0x249   :  { %1432 = vmatmul.mubr.msk.f32.vlgmr.msra.gmra.mrb[2].mxu1 %vm146_vm0, %v1979_v45 }
 0x24a   :  { %1832 = vmatpush3.bf16.msra.mxu1 %v1829_v28  ;;  %1541 = vmatprep.mubr.msk.f32.mxu1 %vm705_vm2, %v1434_v43  ;;  %v2606_v28 = vpack.c.bf16 %v1072_v27, %v1071_v26  ;;  %v972_v26 = vld [vmem:[%s2782_s11 + $0x28] sm:$0xff] }
 0x24b   :  { %1834 = vmatprep.subr.bf16.mxu1 %v1833_v44  ;;  %v1893_v27 = vpack.c.bf16 %v972_v26, %v971_v24  ;;  %v1088_v24 = vld [vmem:[#allocation9] sm:$0x1] }
 0x24c   :  { %1909 = vmatpush3.bf16.msra.mxu0 %v2606_v28 }
 0x24d   :  { %1910 = vmatprep.subr.bf16.mxu0 %v2106_v1 }
 0x24e   :  { %1836 = vmatpush3.bf16.msra.mxu1 %v1833_v44 }
 0x24f   :  { %1838 = vmatprep.subr.bf16.mxu1 %v1837_v49 }
 0x250   :  { %1912 = vmatpush3.bf16.msra.mxu0 %v2616_v31 }
 0x251   :  { %1542 = vmatmul.mubr.msk.f32.vlgmr.msra.gmra.mrb[4].mxu1 %vm705_vm2, %v1435_v8  ;;  %1913 = vmatprep.subr.bf16.mxu0 %v2106_v1 }
 0x252   :  { %1840 = vmatpush3.bf16.msra.mxu1 %v1837_v49 }
 0x253   :  { %1842 = vmatprep.subr.bf16.mxu1 %v1841_v52 }
 0x254   :  { %1915 = vmatpush3.bf16.msra.mxu0 %v1914_v36 }
 0x255   :  { %1916 = vmatprep.subr.bf16.mxu0 %v2106_v1 }
 0x256   :  { %1844 = vmatpush3.bf16.msra.mxu1 %v1841_v52  ;;  %v271_v52 = vld [vmem:[#allocation6] sm:$0x3] }
 0x257   :  { %1846 = vmatprep.subr.bf16.mxu1 %v1845_v55 }
 0x25a   :  { %1848 = vmatpush3.bf16.msra.mxu1 %v1845_v55 }
 0x25b   :  { %1850 = vmatprep.subr.bf16.mxu1 %v1849_v58 }
 0x25e   :  { %1852 = vmatpush3.bf16.msra.mxu1 %v1849_v58 }
 0x25f   :  { %1854 = vmatprep.subr.bf16.mxu1 %v1853_v61 }
 0x262   :  { %1856 = vmatpush3.bf16.msra.mxu1 %v1853_v61 }
 0x263   :  { %1858 = vmatprep.subr.bf16.mxu1 %v1857_v3 }
 0x266   :  { %1860 = vmatpush3.bf16.msra.mxu1 %v1857_v3 }
 0x267   :  { %1862 = vmatprep.subr.bf16.mxu1 %v1861_v5 }
 0x26a   :  { %1864 = vmatpush3.bf16.msra.mxu1 %v1861_v5  ;;  %v793_v5 = vld [vmem:[%s2780_s9 + $0x30] sm:$0xff] }
 0x26b   :  { %1866 = vmatprep.subr.bf16.mxu1 %v1865_v11  ;;  %v1881_v7 = vpack.c.bf16 %v794_v6, %v793_v5 }
 0x26e   :  { %1868 = vmatpush3.bf16.msra.mxu1 %v1865_v11  ;;  %v967_v11 = vld [vmem:[%s2782_s11] sm:$0xff] }
 0x26f   :  { %1870 = vmatprep.subr.bf16.mxu1 %v2578_v15  ;;  %v1885_v14 = vpack.c.bf16 %v968_v13, %v967_v11 }
 0x309   :  { %v604_v32 = vpop.f32.mrb[6].mxu0 }
 0x30a   :  { %v606_v33 = vpop.f32.mrb[7].mxu0 }
 0x31c   :  { %v530_v37 = vpop.f32.mrb[2].mxu1 }
 0x31d   :  { %v532_v39 = vpop.f32.mrb[3].mxu1 }
 0x31e   :  { %v611_v40 = vcombine.low %v530_v37, %v532_v39  ;;  %v1077_v37 = vld [vmem:[%s2786_s15 + $0x50] sm:$0xff] }
 0x320   :  { %v618_v41 = vrot.slane %v611_v40, %v617_v38  ;;  %v1079_v40 = vld [vmem:[%s2786_s15 + $0x60] sm:$0xff] }
 0x322   :  { %v625_v43 = vrot.slane %v618_v41, %v617_v38  ;;  %v1080_v41 = vld [vmem:[%s2786_s15 + $0x68] sm:$0xff] }
 0x324   :  { %v627_v44 = vmul.f32 %v625_v43, %v270_v42  ;;  %v1543_v45 = vpop.f32.mrb[4].mxu1  ;;  %v1920_v42 = vpack.c.bf16 %v1080_v41, %v1079_v40  ;;  %v1081_v43 = vld [vmem:[%s2786_s15 + $0x70] sm:$0xff] }
 0x325   :  { %v778_v46 = vpop.f32.mrb[5].mxu1 }
 0x326   :  { %v632_v8 = vrot.slane %v627_v44, %v2430_v12  ;;  %v636_v47 = vrot.slane %v627_v44, %v2424_v10  ;;  %v1082_v44 = vld [vmem:[%s2786_s15 + $0x78] sm:$0xff] }
 0x328   :  { %v639_v48 = vmul.f32 %v632_v8, %v604_v32  ;;  %v640_v49 = vmul.f32 %v636_v47, %v606_v33  ;;  %v663_v9 = vmul.f32 %v636_v47, %v2442_v23  ;;  %v660_v55 = vmul.f32 %v632_v8, %v2436_v18  ;;  %v790_v23 = vld [vmem:[%s2780_s9 + $0x18] sm:$0xff] }
 0x329   :  { %v662_v57 = vmul.f32 %v632_v8, %v2438_v20  ;;  %v661_v58 = vmul.f32 %v636_v47, %v2434_v17  ;;  %v1873_v4 = vpack.c.bf16 %v790_v23, %v789_v62  ;;  %v792_v17 = vld [vmem:[%s2780_s9 + $0x28] sm:$0xff]  ;;  %v1897_v32 = vpack.c.bf16 %v974_v30, %v973_v29 }
 0x32a   :  { %v643_v50 = vcombine.low %v639_v48, %v640_v49  ;;  %v1084_v8 = vld [vmem:[%s2787_s16 + $0x8] sm:$0xff]  ;;  %v1442_v48 = vld [vmem:[%s2783_s12] ss:$0 sm:$0xff] }
 0x32c   :  { %v650_v51 = vrot.slane %v643_v50, %v617_v38 }
 0x32e   :  { %v657_v53 = vrot.slane %v650_v51, %v617_v38  ;;  %v1078_v38 = vld [vmem:[%s2786_s15 + $0x58] sm:$0xff] }
 0x32f   :  { %v1917_v39 = vpack.c.bf16 %v1078_v38, %v1077_v37 }
 0x330   :  { %v659_v54 = vsub.f32 %v271_v52, %v657_v53 }
 0x331   :  { %1918 = vmatpush3.bf16.msra.mxu0 %v1917_v39 }
 0x332   :  { %v668_v56 = vrot.slane %v659_v54, %v2430_v12  ;;  %v672_v59 = vrot.slane %v659_v54, %v2424_v10  ;;  %v791_v10 = vld [vmem:[%s2780_s9 + $0x20] sm:$0xff]  ;;  %1919 = vmatprep.subr.bf16.mxu0 %v2106_v1 }
 0x333   :  { %v1877_v20 = vpack.c.bf16 %v792_v17, %v791_v10 }
 0x334   :  { %v675_v60 = vadd.f32 %v668_v56, %v660_v55  ;;  %v677_v61 = vadd.f32 %v668_v56, %v662_v57  ;;  %v676_v63 = vadd.f32 %v672_v59, %v661_v58  ;;  %v678_v18 = vadd.f32 %v672_v59, %v663_v9 }
 0x335   :  { %1921 = vmatpush3.bf16.msra.mxu0 %v1920_v42 }
 0x336   :  { %v679_v2 = vmax.f32 %v675_v60, 0.0  ;;  %v681_v3 = vmax.f32 %v677_v61, 0.0  ;;  %v680_v21 = vmax.f32 %v676_v63, 0.0  ;;  %v682_v33 = vmax.f32 %v678_v18, 0.0  ;;  %1922 = vmatprep.subr.bf16.mxu0 %v2106_v1  ;;  %v1086_v18 = vld [vmem:[%s2787_s16 + $0x18] sm:$0xff] }
 0x338   :  { %683 = vst [vmem:[%s2788_s17] sm:$0xff] %v679_v2  ;;  %1576 = vmatprep.mubr.f32.mxu1 %v679_v2  ;;  %684 = vst [vmem:[%s2788_s17 + $0x10] sm:$0xff] %v681_v3 }
 0x339   :  { %1577 = vmatmul.mubr.f32.vlgmr.msra.gmra.mrb[6].mxu1 %v681_v3 }
 0x33a   :  { %1872 = vmatpush3.bf16.msra.mxu1 %v2578_v15  ;;  %1595 = vmatprep.mubr.msk.f32.mxu1 %vm146_vm0, %v778_v46  ;;  %v969_v15 = vld [vmem:[%s2782_s11 + $0x10] sm:$0xff]  ;;  %v1083_v46 = vld [vmem:[%s2787_s16] sm:$0xff] }
 0x33b   :  { %1874 = vmatprep.subr.bf16.mxu1 %v1873_v4  ;;  %v1889_v19 = vpack.c.bf16 %v970_v16, %v969_v15  ;;  %v1950_v47 = vpack.c.bf16 %v1084_v8, %v1083_v46  ;;  %v1087_v15 = vld [vmem:[#allocation7] sm:$0x1] }
 0x33e   :  { %1876 = vmatpush3.bf16.msra.mxu1 %v1873_v4 }
 0x33f   :  { %1878 = vmatprep.subr.bf16.mxu1 %v1877_v20 }
 0x342   :  { %1880 = vmatpush3.bf16.msra.mxu1 %v1877_v20 }
 0x343   :  { %1882 = vmatprep.subr.bf16.mxu1 %v1881_v7 }
 0x346   :  { %1884 = vmatpush3.bf16.msra.mxu1 %v1881_v7 }
 0x347   :  { %1886 = vmatprep.subr.bf16.mxu1 %v1885_v14 }
 0x349   :  { %1596 = vmatmul.mubr.msk.f32.vlgmr.msra.gmra.mrb[6].mxu1 %vm146_vm0, %v1543_v45  ;;  %v1923_v45 = vpack.c.bf16 %v1082_v44, %v1081_v43 }
 0x34a   :  { %1888 = vmatpush3.bf16.msra.mxu1 %v1885_v14  ;;  %1614 = vmatprep.mubr.msk.f32.mxu1 %vm146_vm0, %v680_v21 }
 0x34b   :  { %1890 = vmatprep.subr.bf16.mxu1 %v1889_v19  ;;  %1924 = vmatpush3.bf16.msra.mxu0 %v1923_v45 }
 0x34c   :  { %1925 = vmatprep.subr.bf16.mxu0 %v2106_v1 }
 0x34e   :  { %1892 = vmatpush3.bf16.msra.mxu1 %v1889_v19 }
 0x34f   :  { %1894 = vmatprep.subr.bf16.mxu1 %v1893_v27 }
 0x352   :  { %1896 = vmatpush3.bf16.msra.mxu1 %v1893_v27 }
 0x353   :  { %1898 = vmatprep.subr.bf16.mxu1 %v1897_v32 }
 0x356   :  { %1900 = vmatpush3.bf16.msra.mxu1 %v1897_v32 }
 0x357   :  { %1949 = vmatprep.subr.bf16.mxu1 %v2106_v1 }
 0x359   :  { %1615 = vmatmul.mubr.msk.f32.vlgmr.msra.gmra.mrb[6].mxu1 %vm146_vm0, %v682_v33 }
 0x35a   :  { %1695 = vmatprep.mubr.msk.f32.mxu1 %vm2109_vm4, %v2105_v0  ;;  %1951 = vmatpush3.bf16.msra.mxu1 %v1950_v47 }
 0x35b   :  { %1952 = vmatprep.subr.bf16.mxu1 %v2106_v1 }
 0x42c   :  { %v1616_v49 = vpop.f32.mrb[6].mxu1 }
 0x42d   :  { %v2726_v50 = vadd.f32 %v1616_v49, %v1442_v48  ;;  %v1047_v51 = vpop.f32.mrb[7].mxu1 }
 0x42e   :  { %v2728_v52 = vadd.f32 %v1442_v48, %v1047_v51 }
 0x42f   :  { %v1097_v59 = vmul.f32 %v2726_v50, %v2726_v50 }
 0x430   :  { %v1089_v53 = vadd.f32 %v2726_v50, %v2728_v52  ;;  %v1096_v60 = vmul.f32 %v2728_v52, %v2728_v52 }
 0x432   :  { %v1090_v54 = vrot.slane %v1089_v53, 4  ;;  %v1098_v61 = vadd.f32 %v1097_v59, %v1096_v60 }
 0x434   :  { %v1091_v9 = vadd.f32 %v1090_v54, %v1089_v53  ;;  %v1099_v62 = vrot.slane %v1098_v61, 4 }
 0x436   :  { %v1092_v55 = vrot.slane %v1091_v9, 2 }
 0x438   :  { %v1093_v56 = vadd.f32 %v1092_v55, %v1091_v9 }
 0x43a   :  { %v1094_v57 = vrot.slane %v1093_v56, 1 }
 0x43c   :  { %v1095_v58 = vadd.f32 %v1094_v57, %v1093_v56 }
 0x43e   :  { %1650 = vmatmul.mubr.f32.vlgmr.msra.gmra.mrb[8].mxu0 %v1095_v58 }
 0x43f   :  { %1927 = vmatpush3.bf16.msra.mxu0 %v2590_v22  ;;  %1684 = vmatprep.mubr.msk.f32.mxu0 %vm2109_vm4, %v2105_v0  ;;  %v1100_v22 = vadd.f32 %v1099_v62, %v1098_v61 }
 0x440   :  { %1928 = vmatprep.subr.bf16.mxu0 %v2106_v1 }
 0x441   :  { %v1101_v23 = vrot.slane %v1100_v22, 2 }
 0x443   :  { %1930 = vmatpush3.bf16.msra.mxu0 %v2596_v25  ;;  %v1102_v25 = vadd.f32 %v1101_v23, %v1100_v22 }
 0x444   :  { %1931 = vmatprep.subr.bf16.mxu0 %v2106_v1 }
 0x447   :  { %1933 = vmatpush3.bf16.msra.mxu0 %v2606_v28  ;;  %v1103_v28 = vrot.slane %v1102_v25, 1 }
 0x448   :  { %1934 = vmatprep.subr.bf16.mxu0 %v2106_v1 }
 0x449   :  { %v1104_v63 = vadd.f32 %v1103_v28, %v1102_v25 }
 0x44b   :  { %1936 = vmatpush3.bf16.msra.mxu0 %v2616_v31  ;;  %v1085_v31 = vld [vmem:[%s2787_s16 + $0x10] sm:$0xff] }
 0x44c   :  { %1937 = vmatprep.subr.bf16.mxu0 %v2106_v1  ;;  %v1953_v2 = vpack.c.bf16 %v1086_v18, %v1085_v31 }
 0x44e   :  { %1954 = vmatpush3.bf16.msra.mxu1 %v1953_v2 }
 0x44f   :  { %1939 = vmatpush3.bf16.msra.mxu0 %v1914_v36 }
 0x450   :  { %1940 = vmatprep.subr.bf16.mxu0 %v2106_v1 }
 0x453   :  { %1942 = vmatpush3.bf16.msra.mxu0 %v1917_v39 }
 0x454   :  { %1943 = vmatprep.subr.bf16.mxu0 %v2106_v1 }
 0x457   :  { %1945 = vmatpush3.bf16.msra.mxu0 %v1920_v42 }
 0x458   :  { %1946 = vmatprep.subr.bf16.mxu0 %v2106_v1 }
 0x45b   :  { %1948 = vmatpush3.bf16.msra.mxu0 %v1923_v45 }
 0x45c   :  { %1955 = vmatprep.subr.bf16.mxu0 %v2106_v1 }
 0x45e   :  { %1685 = vmatmul.mubr.f32.vlgmr.msra.gmra.mrb[10].mxu0 %v1104_v63 }
 0x45f   :  { %1957 = vmatpush3.bf16.msra.mxu0 %v1950_v47  ;;  %1706 = vmatprep.mubr.msk.f32.mxu0 %vm2109_vm4, %v2105_v0 }
 0x460   :  { %1958 = vmatprep.subr.bf16.mxu0 %v2106_v1 }
 0x463   :  { %1960 = vmatpush3.bf16.msra.mxu0 %v1953_v2 }
 0x511   :  { %v1171_v3 = vpop.f32.mrb[8].mxu0 }
 0x512   :  { %v1175_v4 = vmul.f32 0.0625, %v1171_v3  ;;  %v1651_v10 = vpop.f32.mrb[9].mxu0 }
 0x514   :  { %1707 = vmatmul.mubr.msk.f32.vlgmr.msra.gmra.mrb[12].mxu0 %vm705_vm2, %v1175_v4  ;;  %v1247_v0 = vmul.f32 %v1175_v4, %v1175_v4 }
 0x531   :  { %v1242_v17 = vpop.f32.mrb[10].mxu0 }
 0x532   :  { %v1246_v20 = vmul.f32 0.0625, %v1242_v17  ;;  %v1686_v1 = vpop.f32.mrb[11].mxu0 }
 0x534   :  { %v1248_v5 = vsub.f32 %v1246_v20, %v1247_v0 }
 0x536   :  { %v1249_v6 = vmax.f32 %v1248_v5, 0.0 }
 0x538   :  { %v1250_v7 = vadd.f32 1e-05, %v1249_v6 }
 0x53a   :  { %1980 = vrsqrt.f32 %v1250_v7 }
 0x544   :  { %v1981_v11 = vpop.eup %1980 }
 0x545   :  { %1696 = vmatmul.mubr.msk.f32.vlgmr.msra.gmra.mrb[8].mxu1 %vm705_vm2, %v1981_v11 }
 0x5e7   :  { %v1394_v13 = vpop.f32.mrb[12].mxu0 }
 0x5e8   :  { %v1708_v14 = vpop.f32.mrb[13].mxu0 }
 0x618   :  { %v1321_v16 = vpop.f32.mrb[8].mxu1 }
 0x619   :  { %v1398_v19 = vmul.f32 %v1321_v16, %v1087_v15  ;;  %v1697_v21 = vpop.f32.mrb[9].mxu1 }
 0x61b   :  { %v1399_v26 = vmul.f32 %v1398_v19, %v1394_v13  ;;  %v1405_v27 = vrot.slane %v1398_v19, %v2430_v12 }
 0x61d   :  { %v1400_v29 = vsub.f32 %v1088_v24, %v1399_v26  ;;  %v1407_v30 = vmul.f32 %v1405_v27, %v2728_v52  ;;  %v1408_v32 = vmul.f32 %v1405_v27, %v2726_v50 }
 0x61f   :  { %v1413_v33 = vrot.slane %v1400_v29, %v2430_v12 }
 0x621   :  { %v1415_v34 = vadd.f32 %v1413_v33, %v1407_v30  ;;  %v1416_v35 = vadd.f32 %v1413_v33, %v1408_v32 }
 0x623   :  { %v1417_v36 = vmax.f32 %v1415_v34, 0.0  ;;  %v1418_v37 = vmax.f32 %v1416_v35, 0.0 }
 0x625   :  { %1419 = vst [vmem:[%s2788_s17 + $0x8] sm:$0xff] %v1417_v36  ;;  %1420 = vst [vmem:[%s2788_s17 + $0x18] sm:$0xff] %v1418_v37 }
 0x626   :  { %1425 = vsyncpa [#allocation3], 1 }
 0x627   :  { %1426 = vsyncpa [#allocation5], 1 }
 0x628   :  { %1427 = vsyncpa [#allocation8], 1 }

</bundles_post_ra>
